<compile_context>
chip_gen: v7x
topology: tpu7x:2x2x1
jax: 0.10.0
libtpu: 0.0.40
codegen_flags: <defaults>
</compile_context>

<pallas_src>
import functools
from types import SimpleNamespace

import jax
import jax.numpy as jnp
from jax.experimental import pallas as pl
from jax.experimental.pallas import tpu as pltpu

Z = 4  # latent dim: enc out_features=8 -> chunk(2, dim=-1) -> 4 + 4


def _rup8(n):
    return -(-n // 8) * 8


def _rup16(n):  # bf16 packs 2 rows per sublane -> 16-row alignment for slices
    return -(-n // 16) * 16


# ----------------------------- packed-parameter layout ---------------------- #
def make_layout(F, H1, H2):
    """Row offsets inside the two packed slabs.

    Weight slab (bf16, 16-row aligned): w1 | w2 | w3_mu cols | w3_logvar cols.
    Const slab  (f32,   8-row aligned): b1 | b2 | b3_mu | b3_logvar | prior_mu
                                        | prior_logvar | prior_invvar.
    """
    w1 = 0
    w2 = w1 + _rup16(F)
    w3m = w2 + _rup16(H1)
    w3l = w3m + _rup16(H2)
    wtotal = w3l + _rup16(H2)

    b1 = 0
    b2 = b1 + 8
    b3m = b2 + 8
    b3l = b3m + 8
    pmu = b3l + 8
    plv = pmu + 8
    piv = plv + 8
    ctotal = piv + 8

    width = max(H1, H2, Z, 8)
    return SimpleNamespace(F=F, H1=H1, H2=H2,
                           w1=w1, w2=w2, w3m=w3m, w3l=w3l,
                           wtotal=wtotal, wwidth=width,
                           b1=b1, b2=b2, b3m=b3m, b3l=b3l,
                           pmu=pmu, plv=plv, piv=piv,
                           ctotal=ctotal, cwidth=width)


def pack_weights(params, L):
    """Pack the matmul weights into one bf16 slab (done once)."""
    w1, _, w2, _, w3, _ = params
    F, H1, H2 = L.F, L.H1, L.H2
    wp = jnp.zeros((L.wtotal, L.wwidth), jnp.float32)
    wp = wp.at[L.w1:L.w1 + F, 0:H1].set(w1)
    wp = wp.at[L.w2:L.w2 + H1, 0:H2].set(w2)
    wp = wp.at[L.w3m:L.w3m + H2, 0:Z].set(w3[:, 0:Z])        # mu columns
    wp = wp.at[L.w3l:L.w3l + H2, 0:Z].set(w3[:, Z:2 * Z])    # logvar columns
    return wp.astype(jnp.bfloat16)


def pack_consts(params, prior_mu, prior_logvar, L):
    """Pack biases + prior constants into one f32 slab (prior_invvar precomputed)."""
    _, b1, _, b2, _, b3 = params
    H1, H2 = L.H1, L.H2
    cp = jnp.zeros((L.ctotal, L.cwidth), jnp.float32)
    cp = cp.at[L.b1:L.b1 + 1, 0:H1].set(b1)
    cp = cp.at[L.b2:L.b2 + 1, 0:H2].set(b2)
    cp = cp.at[L.b3m:L.b3m + 1, 0:Z].set(b3[:, 0:Z])
    cp = cp.at[L.b3l:L.b3l + 1, 0:Z].set(b3[:, Z:2 * Z])
    cp = cp.at[L.pmu:L.pmu + 1, 0:Z].set(prior_mu.reshape(1, Z))
    cp = cp.at[L.plv:L.plv + 1, 0:Z].set(prior_logvar.reshape(1, Z))
    cp = cp.at[L.piv:L.piv + 1, 0:Z].set(jnp.exp(-prior_logvar).reshape(1, Z))
    return cp


# ----------------------------- kernel -------------------------------------- #
def _network_full_kernel(xn_ref, w_ref, c_ref, out_ref, *, L):
    F, H1, H2 = L.F, L.H1, L.H2

    xn = xn_ref[...]                                          # (TB, F+Z) bf16
    x = xn[:, 0:F]                                            # bf16 matmul input
    noise = xn[:, F:F + Z].astype(jnp.float32)                # f32 elementwise

    # Encoder "LinearBlock": Linear -> ReLU -> Linear -> ReLU -> Linear(out=8)
    # TODO(synk): LinearBlock definition not given; assuming ReLU hidden activations.
    # bf16 MXU matmuls with f32 accumulation; bias add / ReLU in f32.
    h = jnp.dot(x, w_ref[L.w1:L.w1 + F, 0:H1],
                preferred_element_type=jnp.float32)
    h = jnp.maximum(h + c_ref[L.b1:L.b1 + 1, 0:H1], 0.0)
    h = jnp.dot(h, w_ref[L.w2:L.w2 + H1, 0:H2],
                preferred_element_type=jnp.float32)
    h = jnp.maximum(h + c_ref[L.b2:L.b2 + 1, 0:H2], 0.0)

    # Final layer split into mu / logvar column blocks (no narrow mid-vreg slices).
    mu = (jnp.dot(h, w_ref[L.w3m:L.w3m + H2, 0:Z],
                  preferred_element_type=jnp.float32)
          + c_ref[L.b3m:L.b3m + 1, 0:Z])                      # (TB, Z)
    logvar = (jnp.dot(h, w_ref[L.w3l:L.w3l + H2, 0:Z],
                      preferred_element_type=jnp.float32)
              + c_ref[L.b3l:L.b3l + 1, 0:Z])                  # (TB, Z)

    # reparameterize_normal (noise supplied)
    sample = mu + jnp.exp(0.5 * logvar) * noise               # (TB, Z)

    # decode: sigmoid on lanes 0:2, tanh on lanes 2:4 — one full-width select
    lane = jax.lax.broadcasted_iota(jnp.int32, sample.shape, 1)
    head = jnp.where(lane < 2, jax.nn.sigmoid(sample), jnp.tanh(sample))

    # compute_kld_normal against packed prior constants (invvar precomputed)
    pmu = c_ref[L.pmu:L.pmu + 1, 0:Z]
    plv = c_ref[L.plv:L.plv + 1, 0:Z]
    piv = c_ref[L.piv:L.piv + 1, 0:Z]
    kld = 0.5 * (plv - logvar + piv * ((mu - pmu) ** 2 + jnp.exp(logvar)) - 1.0)
    kld_sum = jnp.sum(kld, axis=-1, keepdims=True)            # (TB, 1)

    # One full-block store: [scl0, scl1, trs0, trs1, kld, kld, kld, kld]
    out_ref[...] = jnp.concatenate(
        [head, jnp.broadcast_to(kld_sum, head.shape)], axis=-1)


# ----------------------------- wrapper -------------------------------------- #
def network_full_forward(x, noise, w_packed, c_packed, L, *, batch_tile=None):
    B, F = x.shape
    assert F == L.F and noise.shape == (B, Z)

    # Fuse noise into the x slab (one streamed input) and cast to bf16 for the
    # MXU path / halved HBM read.
    xn = jnp.concatenate([x, noise], axis=-1).astype(jnp.bfloat16)

    if batch_tile is None:
        # Big tiles: per-grid-step overhead (~0.35 us) dominates at small tiles;
        # per-tile VMEM at TB=2048 is only a few MB.
        batch_tile = min(B, 2048)
        # Keep >= 2 grid steps when B is large so v7x's 2 TensorCores both work.
        if batch_tile == B and B >= 1024 and B % 2 == 0:
            batch_tile = B // 2
    TB = batch_tile
    assert B % TB == 0 and (TB % 16 == 0 or TB == B)

    out = pl.pallas_call(
        functools.partial(_network_full_kernel, L=L),
        out_shape=jax.ShapeDtypeStruct((B, 2 * Z), jnp.float32),
        grid=(B // TB,),
        in_specs=[
            pl.BlockSpec((TB, F + Z), lambda i: (i, 0)),               # x+noise (streamed)
            pl.BlockSpec((L.wtotal, L.wwidth), lambda i: (0, 0)),      # bf16 weights (resident)
            pl.BlockSpec((L.ctotal, L.cwidth), lambda i: (0, 0)),      # f32 biases/priors (resident)
        ],
        out_specs=pl.BlockSpec((TB, 2 * Z), lambda i: (i, 0)),         # fused output slab
        compiler_params=pltpu.CompilerParams(
            dimension_semantics=("parallel",),
            # Above v5e's 16 MiB scoped default so very large TB never trips it;
            # harmless on v6e/v7x (actual usage is a few MB at TB=2048).
            vmem_limit_bytes=32 * 1024 * 1024),
    )(xn, w_packed, c_packed)

    return {"scl": out[:, 0:2], "trs": out[:, 2:Z], "stn_kld": out[:, Z]}


# ----------------------------- parameter init ------------------------------- #
def init_params(key, in_features, hidden_list, out_features):
    """Deterministic init, shapes match LinearBlock(hidden_list, in, out)."""
    dims = [in_features] + list(hidden_list) + [out_features]
    params = []
    for i in range(len(dims) - 1):
        key, kw, kb = jax.random.split(key, 3)
        bound = 1.0 / jnp.sqrt(dims[i])
        w = jax.random.uniform(kw, (dims[i], dims[i + 1]), jnp.float32, -bound, bound)
        b = jax.random.uniform(kb, (1, dims[i + 1]), jnp.float32, -bound, bound)
        params += [w, b]
    return tuple(params)


# ----------------------------- pure-JAX reference --------------------------- #
def reference_forward(x, noise, params, prior_mu, prior_logvar):
    w1, b1, w2, b2, w3, b3 = params
    h = jax.nn.relu(x @ w1 + b1)
    h = jax.nn.relu(h @ w2 + b2)
    enc = h @ w3 + b3
    mu, logvar = enc[:, :Z], enc[:, Z:]
    sample = mu + jnp.exp(0.5 * logvar) * noise
    scl = jax.nn.sigmoid(sample[:, :2])
    trs = jnp.tanh(sample[:, 2:])
    piv = jnp.exp(-prior_logvar)
    kld = 0.5 * (prior_logvar - logvar + piv * ((mu - prior_mu) ** 2
                                                + jnp.exp(logvar)) - 1.0)
    return scl, trs, kld.sum(-1)


# ----------------------------- main ----------------------------------------- #
if __name__ == "__main__":
    config = {
        "prior_stn_mu": [0.0, 0.0, 0.0, 0.0],
        "prior_stn_std": [1.0, 1.0, 1.0, 1.0],
        "enc_stn_hidden": [32, 32],
        "state_full_size": 32,
    }
    # Small smoke-test shapes; force 2 grid steps to exercise the streaming
    # pipeline (production default batch_tile is min(B, 2048)).
    B, TB = 64, 32

    key = jax.random.PRNGKey(0)
    k_x, k_noise, k_params = jax.random.split(key, 3)

    F = config["state_full_size"]
    H1, H2 = config["enc_stn_hidden"]

    x = jax.random.normal(k_x, (B, F), jnp.float32)
    noise = jax.random.normal(k_noise, (B, Z), jnp.float32)   # randn_like(std)

    params = init_params(k_params, F, [H1, H2], out_features=2 * Z)

    prior_mu = jnp.asarray(config["prior_stn_mu"], jnp.float32)
    prior_logvar = 2.0 * jnp.log(jnp.asarray(config["prior_stn_std"], jnp.float32))

    L = make_layout(F, H1, H2)
    w_packed = pack_weights(params, L)
    c_packed = pack_consts(params, prior_mu, prior_logvar, L)

    out = network_full_forward(x, noise, w_packed, c_packed, L, batch_tile=TB)
    jax.block_until_ready(out)

    assert out["scl"].shape == (B, 2)
    assert out["trs"].shape == (B, 2)
    assert out["stn_kld"].shape == (B,)

    # ---- Check 1 (tight): against a reference that applies the SAME bf16
    # quantization to x / noise / weights — catches packing & layout bugs.
    q = lambda a: a.astype(jnp.bfloat16).astype(jnp.float32)
    w1, b1, w2, b2, w3, b3 = params
    params_q = (q(w1), b1, q(w2), b2, q(w3), b3)
    qscl, qtrs, qkld = reference_forward(q(x), q(noise), params_q,
                                         prior_mu, prior_logvar)
    assert bool(jnp.allclose(out["scl"], qscl, atol=1e-3, rtol=1e-3))
    assert bool(jnp.allclose(out["trs"], qtrs, atol=1e-3, rtol=1e-3))
    assert bool(jnp.allclose(out["stn_kld"], qkld, atol=1e-3, rtol=1e-3))

    # ---- Check 2 (loose): against the full-f32 module semantics; tolerance
    # sized for the bf16 input/weight quantization.
    ref_scl, ref_trs, ref_kld = reference_forward(x, noise, params,
                                                  prior_mu, prior_logvar)
    assert bool(jnp.allclose(out["scl"], ref_scl, atol=5e-2, rtol=5e-2))
    assert bool(jnp.allclose(out["trs"], ref_trs, atol=5e-2, rtol=5e-2))
    assert bool(jnp.allclose(out["stn_kld"], ref_kld, atol=5e-2, rtol=5e-2))

    print("KERNEL_OK")
</pallas_src>

<mosaic_0001>
module attributes {stable_mosaic.version = 11 : i64} {
  func.func @_network_full_kernel(%arg0: i32, %arg1: memref<32x36xbf16, #tpu.memory_space<vmem>>, %arg2: memref<128x32xbf16, #tpu.memory_space<vmem>>, %arg3: memref<56x32xf32, #tpu.memory_space<vmem>>, %arg4: memref<32x8xf32, #tpu.memory_space<vmem>>) attributes {dimension_semantics = [#tpu.dimension_semantics<parallel>], iteration_bounds = array<i64: 2>, scalar_prefetch = 0 : i64, scratch_operands = 0 : i64, tpu.core_type = #tpu.core_type<tc>, window_params = [{transform_indices = @transform_0, window_bounds = array<i64: 32, 36>}, {pipeline_mode = #tpu.pipeline_mode<synchronous>, transform_indices = @transform_1, window_bounds = array<i64: 128, 32>}, {pipeline_mode = #tpu.pipeline_mode<synchronous>, transform_indices = @transform_2, window_bounds = array<i64: 56, 32>}, {transform_indices = @transform_3, window_bounds = array<i64: 32, 8>}]} {
    %c0 = arith.constant 0 : index
    %c0_0 = arith.constant 0 : index
    %0 = vector.load %arg1[%c0, %c0_0] : memref<32x36xbf16, #tpu.memory_space<vmem>>, vector<32x36xbf16>
    %1 = vector.extract_strided_slice %0 {offsets = [0, 0], sizes = [32, 32], strides = [1, 1]} : vector<32x36xbf16> to vector<32x32xbf16>
    %2 = vector.extract_strided_slice %0 {offsets = [0, 32], sizes = [32, 4], strides = [1, 1]} : vector<32x36xbf16> to vector<32x4xbf16>
    %3 = arith.extf %2 : vector<32x4xbf16> to vector<32x4xf32>
    %c0_1 = arith.constant 0 : index
    %c0_2 = arith.constant 0 : index
    %4 = vector.load %arg2[%c0_1, %c0_2] : memref<128x32xbf16, #tpu.memory_space<vmem>>, vector<32x32xbf16>
    %cst = arith.constant dense<0.000000e+00> : vector<32x32xf32>
    %5 = tpu.matmul %1, %4, %cst {dimension_numbers = #tpu.dot_dimension_numbers<[1], [0], [0], [1], [0, 0, 1, 1], [], []>} : vector<32x32xbf16>, vector<32x32xbf16>, vector<32x32xf32> -> vector<32x32xf32>
    %c0_3 = arith.constant 0 : index
    %c0_4 = arith.constant 0 : index
    %6 = vector.load %arg3[%c0_3, %c0_4] : memref<56x32xf32, #tpu.memory_space<vmem>>, vector<1x32xf32>
    %7 = vector.broadcast %6 : vector<1x32xf32> to vector<32x32xf32>
    %8 = arith.addf %5, %7 : vector<32x32xf32>
    %cst_5 = arith.constant 0.000000e+00 : f32
    %9 = vector.broadcast %cst_5 : f32 to vector<32x32xf32>
    %10 = arith.maximumf %8, %9 : vector<32x32xf32>
    %c32 = arith.constant 32 : index
    %c0_6 = arith.constant 0 : index
    %11 = vector.load %arg2[%c32, %c0_6] : memref<128x32xbf16, #tpu.memory_space<vmem>>, vector<32x32xbf16>
    %cst_7 = arith.constant dense<0.000000e+00> : vector<32x32xf32>
    %12 = tpu.matmul %10, %11, %cst_7 {dimension_numbers = #tpu.dot_dimension_numbers<[1], [0], [0], [1], [0, 0, 1, 1], [], []>} : vector<32x32xf32>, vector<32x32xbf16>, vector<32x32xf32> -> vector<32x32xf32>
    %c8 = arith.constant 8 : index
    %c0_8 = arith.constant 0 : index
    %13 = vector.load %arg3[%c8, %c0_8] : memref<56x32xf32, #tpu.memory_space<vmem>>, vector<1x32xf32>
    %14 = vector.broadcast %13 : vector<1x32xf32> to vector<32x32xf32>
    %15 = arith.addf %12, %14 : vector<32x32xf32>
    %cst_9 = arith.constant 0.000000e+00 : f32
    %16 = vector.broadcast %cst_9 : f32 to vector<32x32xf32>
    %17 = arith.maximumf %15, %16 : vector<32x32xf32>
    %c64 = arith.constant 64 : index
    %c0_10 = arith.constant 0 : index
    %18 = vector.load %arg2[%c64, %c0_10] : memref<128x32xbf16, #tpu.memory_space<vmem>>, vector<32x4xbf16>
    %cst_11 = arith.constant dense<0.000000e+00> : vector<32x4xf32>
    %19 = tpu.matmul %17, %18, %cst_11 {dimension_numbers = #tpu.dot_dimension_numbers<[1], [0], [0], [1], [0, 0, 1, 1], [], []>} : vector<32x32xf32>, vector<32x4xbf16>, vector<32x4xf32> -> vector<32x4xf32>
    %c16 = arith.constant 16 : index
    %c0_12 = arith.constant 0 : index
    %20 = vector.load %arg3[%c16, %c0_12] : memref<56x32xf32, #tpu.memory_space<vmem>>, vector<1x4xf32>
    %21 = vector.broadcast %20 : vector<1x4xf32> to vector<32x4xf32>
    %22 = arith.addf %19, %21 : vector<32x4xf32>
    %c96 = arith.constant 96 : index
    %c0_13 = arith.constant 0 : index
    %23 = vector.load %arg2[%c96, %c0_13] : memref<128x32xbf16, #tpu.memory_space<vmem>>, vector<32x4xbf16>
    %cst_14 = arith.constant dense<0.000000e+00> : vector<32x4xf32>
    %24 = tpu.matmul %17, %23, %cst_14 {dimension_numbers = #tpu.dot_dimension_numbers<[1], [0], [0], [1], [0, 0, 1, 1], [], []>} : vector<32x32xf32>, vector<32x4xbf16>, vector<32x4xf32> -> vector<32x4xf32>
    %c24 = arith.constant 24 : index
    %c0_15 = arith.constant 0 : index
    %25 = vector.load %arg3[%c24, %c0_15] : memref<56x32xf32, #tpu.memory_space<vmem>>, vector<1x4xf32>
    %26 = vector.broadcast %25 : vector<1x4xf32> to vector<32x4xf32>
    %27 = arith.addf %24, %26 : vector<32x4xf32>
    %cst_16 = arith.constant 5.000000e-01 : f32
    %28 = vector.broadcast %cst_16 : f32 to vector<32x4xf32>
    %29 = arith.mulf %28, %27 : vector<32x4xf32>
    %30 = math.exp %29 : vector<32x4xf32>
    %31 = arith.mulf %30, %3 : vector<32x4xf32>
    %32 = arith.addf %22, %31 : vector<32x4xf32>
    %33 = tpu.iota {dimensions = array<i32: 1>} : vector<32x4xi32>
    %c2_i32 = arith.constant 2 : i32
    %34 = vector.broadcast %c2_i32 : i32 to vector<32x4xi32>
    %35 = arith.cmpi slt, %33, %34 : vector<32x4xi32>
    %36 = arith.negf %32 : vector<32x4xf32>
    %37 = math.exp %36 : vector<32x4xf32>
    %cst_17 = arith.constant 1.000000e+00 : f32
    %38 = vector.broadcast %cst_17 : f32 to vector<32x4xf32>
    %39 = arith.addf %38, %37 : vector<32x4xf32>
    %40 = arith.divf %38, %39 : vector<32x4xf32>
    %41 = math.tanh %32 : vector<32x4xf32>
    %42 = arith.select %35, %40, %41 : vector<32x4xi1>, vector<32x4xf32>
    %c32_18 = arith.constant 32 : index
    %c0_19 = arith.constant 0 : index
    %43 = vector.load %arg3[%c32_18, %c0_19] : memref<56x32xf32, #tpu.memory_space<vmem>>, vector<1x4xf32>
    %c40 = arith.constant 40 : index
    %c0_20 = arith.constant 0 : index
    %44 = vector.load %arg3[%c40, %c0_20] : memref<56x32xf32, #tpu.memory_space<vmem>>, vector<1x4xf32>
    %c48 = arith.constant 48 : index
    %c0_21 = arith.constant 0 : index
    %45 = vector.load %arg3[%c48, %c0_21] : memref<56x32xf32, #tpu.memory_space<vmem>>, vector<1x4xf32>
    %46 = vector.broadcast %44 : vector<1x4xf32> to vector<32x4xf32>
    %47 = arith.subf %46, %27 : vector<32x4xf32>
    %48 = vector.broadcast %43 : vector<1x4xf32> to vector<32x4xf32>
    %49 = arith.subf %22, %48 : vector<32x4xf32>
    %50 = arith.mulf %49, %49 : vector<32x4xf32>
    %51 = math.exp %27 : vector<32x4xf32>
    %52 = arith.addf %50, %51 : vector<32x4xf32>
    %53 = vector.broadcast %45 : vector<1x4xf32> to vector<32x4xf32>
    %54 = arith.mulf %53, %52 : vector<32x4xf32>
    %55 = arith.addf %47, %54 : vector<32x4xf32>
    %cst_22 = arith.constant 1.000000e+00 : f32
    %56 = vector.broadcast %cst_22 : f32 to vector<32x4xf32>
    %57 = arith.subf %55, %56 : vector<32x4xf32>
    %cst_23 = arith.constant 5.000000e-01 : f32
    %58 = vector.broadcast %cst_23 : f32 to vector<32x4xf32>
    %59 = arith.mulf %58, %57 : vector<32x4xf32>
    %cst_24 = arith.constant dense<0.000000e+00> : vector<32xf32>
    %60 = vector.multi_reduction <add>, %59, %cst_24 [1] : vector<32x4xf32> to vector<32xf32>
    %61 = vector.shape_cast %60 : vector<32xf32> to vector<32x1xf32>
    %62 = vector.shape_cast %61 : vector<32x1xf32> to vector<32x1xf32>
    %63 = vector.broadcast %62 : vector<32x1xf32> to vector<32x4xf32>
    %64 = tpu.concatenate %42, %63 in 1 : vector<32x4xf32>, vector<32x4xf32> -> vector<32x8xf32>
    %c0_25 = arith.constant 0 : index
    %c0_26 = arith.constant 0 : index
    %65 = vector.load %arg4[%c0_25, %c0_26] : memref<32x8xf32, #tpu.memory_space<vmem>>, vector<32x8xf32>
    tpu.vector_store %arg4[%c0_25, %c0_26], %64 {strides = array<i32>} : memref<32x8xf32, #tpu.memory_space<vmem>>, vector<32x8xf32>,
    return
  }
  func.func @transform_0(%arg0: i32) -> (i32, i32) {
    %c0_i32 = arith.constant 0 : i32
    %c0_i32_0 = arith.constant 0 : i32
    return %arg0, %c0_i32 : i32, i32
  }
  func.func @transform_1(%arg0: i32) -> (i32, i32) {
    %c0_i32 = arith.constant 0 : i32
    %c0_i32_0 = arith.constant 0 : i32
    %c0_i32_1 = arith.constant 0 : i32
    return %c0_i32, %c0_i32_0 : i32, i32
  }
  func.func @transform_2(%arg0: i32) -> (i32, i32) {
    %c0_i32 = arith.constant 0 : i32
    %c0_i32_0 = arith.constant 0 : i32
    %c0_i32_1 = arith.constant 0 : i32
    return %c0_i32, %c0_i32_0 : i32, i32
  }
  func.func @transform_3(%arg0: i32) -> (i32, i32) {
    %c0_i32 = arith.constant 0 : i32
    %c0_i32_0 = arith.constant 0 : i32
    return %arg0, %c0_i32 : i32, i32
  }
}

</mosaic_0001>

<bundles_post_ra>
// kernel: tpu_custom_call.1
= control target key start
LH: loop header
LB: loop body
LE: loop exit
PB: predicated region body
PF: predicated region fallthrough
CT: control target
= control target key end

     0   :  { %s938_s12 = smov 0   ;;  %s1054_s0 = inlined_call_operand.vmem [shape: bf16[64,36], index: 0, kind: input, shape index: {}]   ;;  %s1055_s1 = inlined_call_operand.vmem [shape: bf16[128,32], index: 1, kind: input, shape index: {}]   ;;  %s1056_s2 = inlined_call_operand.vmem [shape: f32[56,32], index: 2, kind: input, shape index: {}]   ;;  %s1057_s3 = inlined_call_operand.vmem [shape: f32[64,8], index: 3, kind: output, shape index: {}]  }
   0x1 LB: > { %s728_s13 = sadd.s32 4294967295, %s915_s12   ;;  %p732_p0 = scmp.ge.s32.totalorder %s915_s12, 1  ;;  %s915_s12 = sphi %s938_s12, %s13_s12  }
   0x2   : > { %p138_p1 = scmp.lt.s32.totalorder %s915_s12, 3 }
   0x4   : > { %p139_p2 = pnand %p732_p0, %p138_p1 }
   0x5   : > { %v857_v0 = vld [vmem:[%s1055_s1] sm:$0xff] (!%p139_p2)   ;;  %s733_s16 = sshll.u32 (!%p139_p2), %s728_s13, 2  ;;  %v858_v1 = vld [vmem:[%s1055_s1 + $0x8] sm:$0xff] (!%p139_p2)   ;;  %vm214_vm0 = vcmask (!%p139_p2), 261120   ;;  %v861_v4 = vld [vmem:[%s1055_s1 + $0x10] sm:$0xff] (!%p139_p2)   ;;  %s917_s10 = smov (!%p139_p2), 96  }
   0x6   : > { %142 = sbr.rel (%p139_p2) target bundleno = 845 (0x34d), region = 32  ;;  %p163_p3 = scmp.lt.s32.totalorder (!%p139_p2), %s733_s16, 7  ;;  %800 = vmatprep.subr.bf16.mxu0 (!%p139_p2), %v857_v0  ;;  %808 = vmatprep.subr.bf16.mxu1 (!%p139_p2), %v861_v4  ;;  %v862_v5 = vld [vmem:[%s1055_s1 + $0x18] sm:$0xff] (!%p139_p2)   ;;  %v863_v6 = vld [vmem:[%s1055_s1 + $0x30] sm:$0xff] (!%p139_p2)   ;;  %v864_v7 = vld [vmem:[%s1055_s1 + $0x20] sm:$0xff] (!%p139_p2)   ;;  %vm650_vm1 = vcmask (!%p139_p2), 31744  }
   0x7   : > { %801 = vmatpush3.bf16.msra.mxu0 (!%p139_p2), %v857_v0  ;;  %809 = vmatpush3.bf16.msra.mxu1 (!%p139_p2), %v861_v4  ;;  %v737_v8 = vld [vmem:[%s1056_s2] ss:$0 sm:$0xff] (!%p139_p2)  ;;  %v865_v21 = vld [vmem:[%s1055_s1 + $0x38] sm:$0xff] (!%p139_p2)   ;;  %v866_v22 = vld [vmem:[%s1055_s1 + $0x28] sm:$0xff] (!%p139_p2)   ;;  %vm667_vm3 = vcmask (!%p139_p2), 64512  }
   0x8   : > { %802 = vmatprep.subr.bf16.mxu0 (!%p139_p2), %v858_v1  ;;  %810 = vmatprep.subr.bf16.mxu1 (!%p139_p2), %v862_v5  ;;  %v744_v29 = vld [vmem:[%s1056_s2 + $0x8] ss:$0 sm:$0xff] (!%p139_p2)  ;;  %v758_v42 = vld [vmem:[%s1056_s2 + $0x18] ss:$0 sm:$0xff] (!%p139_p2)  ;;  %v751_v49 = vld [vmem:[%s1056_s2 + $0x10] ss:$0 sm:$0xff] (!%p139_p2) }
   0x9   : > { %v770_v62 = vld [vmem:[%s1056_s2 + $0x20] ss:$0 sm:$0xff] (!%p139_p2) }
   0xb   : > { %803 = vmatpush3.bf16.msra.mxu0 (!%p139_p2), %v858_v1  ;;  %811 = vmatpush3.bf16.msra.mxu1 (!%p139_p2), %v862_v5 }
   0xc   : > { %828 = vmatprep.subr.bf16.mxu1 (!%p139_p2), %v863_v6  ;;  %818 = vmatprep.subr.bf16.mxu0 (!%p139_p2), %v864_v7 }
   0xd   : > { %s1059_s16 = smov (!%p163_p3, %s733_s16), 7 }
   0xe   : > { %s734_s19 = sshll.u32 %s1059_s16, 2  ;;  %s736_s25 = sshll.u32 %s1059_s16, 3 }
   0xf   : > { %s166_s22 = scalar_lea.vmem %s1054_s0, %s734_s19  ;;  %s172_s28 = scalar_lea.vmem %s1057_s3, %s736_s25 }
  0x10   : > { %v175_v2 = vld [vmem:[%s166_s22] sm:$0xff]   ;;  %v177_v3 = vld [vmem:[%s166_s22 + $0x8] sm:$0xff]  }
  0x11   : > { %804 = vmatprep.mubr.msk.bf16.mxu0 %vm214_vm0, %v175_v2  ;;  %v179_v23 = vunpack.c.l.bf16 %v175_v2  ;;  %v180_v24 = vunpack.c.h.bf16 %v175_v2  ;;  %v181_v25 = vunpack.c.l.bf16 %v177_v3  ;;  %v182_v26 = vunpack.c.h.bf16 %v177_v3 }
  0x12   : > { %805 = vmatmul.mubr.msk.bf16.vlgmr.msra.gmra.mrb[0].mxu0 %vm214_vm0, %v177_v3 }
  0x13   : > { %819 = vmatpush3.bf16.msra.mxu0 %v864_v7  ;;  %v847_v27 = vpack.i.bf16 %v180_v24, %v179_v23  ;;  %v852_v28 = vpack.i.bf16 %v182_v26, %v181_v25 }
  0x14   : > { %820 = vmatprep.subr.bf16.mxu0 %v866_v22 }
  0x15   : > { %848 = vrot.lane.b32.xlu0 %v847_v27, %s917_s10 }
  0x17   : > { %821 = vmatpush3.bf16.msra.mxu0 %v866_v22 }
  0x19   : > { %853 = vrot.lane.b32.xlu0 %v852_v28, %s917_s10 }
  0x87   : > { %v849_v3 = vpop.permute.xlu0 %848 }
  0xe5   : > { %v806_v9 = vpop.f32.mrb[0].mxu0 }
  0xe6   : > { %v255_v10 = vpop.f32.mrb[1].mxu0  ;;  %v264_v13 = vadd.f32 %v806_v9, %v737_v8 }
  0xe7   : > { %v256_v11 = vadd.f32 %v737_v8, %v255_v10  ;;  %v807_v12 = vpop.f32.mrb[2].mxu0 }
  0xe8   : > { %v258_v14 = vpop.f32.mrb[3].mxu0  ;;  %v267_v17 = vadd.f32 %v807_v12, %v737_v8  ;;  %v272_v19 = vmax.f32 %v264_v13, 0.0  ;;  %v851_v12 = vunpack.i.h.bf16 %v849_v3  ;;  %v854_v13 = vpop.permute.xlu0 %853 }
  0xe9   : > { %v270_v15 = vmax.f32 %v256_v11, 0.0  ;;  %v259_v16 = vadd.f32 %v737_v8, %v258_v14  ;;  %v856_v24 = vunpack.i.h.bf16 %v854_v13 }
  0xea   : > { %v273_v20 = vmax.f32 %v267_v17, 0.0 }
  0xeb   : > { %v271_v18 = vmax.f32 %v259_v16, 0.0  ;;  %812 = vmatprep.mubr.msk.f32.mxu1 %vm214_vm0, %v270_v15  ;;  %v769_v16 = vld [vmem:[%s1056_s2 + $0x28] ss:$0 sm:$0xff] }
  0xed   : > { %813 = vmatmul.mubr.msk.f32.vlgmr.msra.gmra.mrb[0].mxu1 %vm214_vm0, %v271_v18 }
  0xee   : > { %815 = vmatprep.mubr.msk.f32.mxu1 %vm214_vm0, %v272_v19  ;;  %829 = vmatpush3.bf16.msra.mxu1 %v863_v6  ;;  %v850_v19 = vunpack.i.l.bf16 %v849_v3 }
  0xef   : > { %830 = vmatprep.subr.bf16.mxu1 %v865_v21 }
  0xf1   : > { %816 = vmatmul.mubr.msk.f32.gmra.mrb[2].mxu1 %vm214_vm0, %v273_v20  ;;  %v771_v20 = vld [vmem:[%s1056_s2 + $0x30] ss:$0 sm:$0xff] }
  0xf2   : > { %831 = vmatpush3.bf16.msra.mxu1 %v865_v21 }
 0x1c0   : > { %v814_v30 = vpop.f32.mrb[0].mxu1 }
 0x1c1   : > { %v347_v31 = vadd.f32 %v814_v30, %v744_v29  ;;  %v341_v32 = vpop.f32.mrb[1].mxu1 }
 0x1c2   : > { %v342_v33 = vadd.f32 %v744_v29, %v341_v32 }
 0x1c3   : > { %v361_v36 = vmax.f32 %v347_v31, 0.0 }
 0x1c4   : > { %v360_v34 = vmax.f32 %v342_v33, 0.0  ;;  %v817_v35 = vpop.f32.mrb[2].mxu1 }
 0x1c5   : > { %v357_v37 = vadd.f32 %v817_v35, %v744_v29  ;;  %v351_v38 = vpop.f32.mrb[3].mxu1 }
 0x1c6   : > { %v352_v39 = vadd.f32 %v744_v29, %v351_v38  ;;  %822 = vmatprep.mubr.msk.f32.mxu0 %vm214_vm0, %v360_v34  ;;  %832 = vmatprep.mubr.msk.f32.mxu1 %vm214_vm0, %v360_v34 }
 0x1c7   : > { %823 = vmatmul.mubr.msk.f32.vlgmr.msra.gmra.mrb[4].mxu0 %vm214_vm0, %v361_v36  ;;  %833 = vmatmul.mubr.msk.f32.vlgmr.msra.gmra.mrb[4].mxu1 %vm214_vm0, %v361_v36  ;;  %v363_v41 = vmax.f32 %v357_v37, 0.0  ;;  %v855_v37 = vunpack.i.l.bf16 %v854_v13 }
 0x1c8   : > { %v362_v40 = vmax.f32 %v352_v39, 0.0 }
 0x1ca   : > { %825 = vmatprep.mubr.msk.f32.mxu0 %vm214_vm0, %v362_v40  ;;  %835 = vmatprep.mubr.msk.f32.mxu1 %vm214_vm0, %v362_v40 }
 0x1cb   : > { %826 = vmatmul.mubr.msk.f32.gmra.mrb[6].mxu0 %vm214_vm0, %v363_v41  ;;  %836 = vmatmul.mubr.msk.f32.gmra.mrb[6].mxu1 %vm214_vm0, %v363_v41 }
 0x29a   : > { %v824_v43 = vpop.f32.mrb[4].mxu0  ;;  %v834_v44 = vpop.f32.mrb[4].mxu1 }
 0x29b   : > { %v999_v45 = vadd.f32 %v834_v44, %v758_v42  ;;  %v431_v46 = vpop.f32.mrb[5].mxu0  ;;  %v505_v47 = vpop.f32.mrb[5].mxu1  ;;  %v437_v59 = vadd.f32 %v824_v43, %v751_v49 }
 0x29c   : > { %v1001_v48 = vadd.f32 %v758_v42, %v505_v47  ;;  %v432_v63 = vadd.f32 %v751_v49, %v431_v46 }
 0x29d   : > { %v525_v50 = vmul.f32 0.5, %v999_v45  ;;  %v620_v51 = vmul.f32 1.442695, %v999_v45  ;;  %v611_v5 = vsub.f32 %v437_v59, %v770_v62  ;;  %v603_v29 = vsub.f32 %v769_v16, %v999_v45 }
 0x29e   : > { %v524_v52 = vmul.f32 0.5, %v1001_v48  ;;  %v618_v53 = vmul.f32 1.442695, %v1001_v48  ;;  %v827_v54 = vpop.f32.mrb[6].mxu0  ;;  %v837_v55 = vpop.f32.mrb[6].mxu1  ;;  %v610_v8 = vsub.f32 %v432_v63, %v770_v62  ;;  %v602_v27 = vsub.f32 %v769_v16, %v1001_v48 }
 0x29f   : > { %v530_v56 = vmul.f32 1.442695, %v525_v50  ;;  %869 = vpow2.f32 %v620_v51  ;;  %v441_v57 = vpop.f32.mrb[7].mxu0  ;;  %v515_v58 = vpop.f32.mrb[7].mxu1  ;;  %v1010_v61 = vadd.f32 %v837_v55, %v758_v42  ;;  %v447_v9 = vadd.f32 %v827_v54, %v751_v49 }
 0x2a0   : > { %v528_v60 = vmul.f32 1.442695, %v524_v52  ;;  %871 = vpow2.f32 %v618_v53  ;;  %v1015_v0 = vadd.f32 %v758_v42, %v515_v58  ;;  %v615_v11 = vmul.f32 %v611_v5, %v611_v5 }
 0x2a1   : > { %873 = vpow2.f32 %v530_v56  ;;  %v527_v1 = vmul.f32 0.5, %v1010_v61  ;;  %v624_v2 = vmul.f32 1.442695, %v1010_v61  ;;  %v614_v15 = vmul.f32 %v610_v8, %v610_v8 }
 0x2a2   : > { %875 = vpow2.f32 %v528_v60  ;;  %v526_v4 = vmul.f32 0.5, %v1015_v0  ;;  %v622_v7 = vmul.f32 1.442695, %v1015_v0  ;;  %v613_v17 = vsub.f32 %v447_v9, %v770_v62 }
 0x2a3   : > { %v534_v6 = vmul.f32 1.442695, %v527_v1  ;;  %877 = vpow2.f32 %v624_v2  ;;  %v442_v18 = vadd.f32 %v751_v49, %v441_v57  ;;  %v605_v49 = vsub.f32 %v769_v16, %v1010_v61 }
 0x2a4   : > { %v532_v10 = vmul.f32 1.442695, %v526_v4  ;;  %v617_v31 = vmul.f32 %v613_v17, %v613_v17  ;;  %v560_v17 = vlaneseq }
 0x2a5   : > { %879 = vpow2.f32 %v534_v6  ;;  %v612_v32 = vsub.f32 %v442_v18, %v770_v62 }
 0x2a6   : > { %881 = vpow2.f32 %v532_v10 }
 0x2a7   : > { %883 = vpow2.f32 %v622_v7  ;;  %v616_v46 = vmul.f32 %v612_v32, %v612_v32 }
 0x2a9   : > { %v870_v14 = vpop.eup %869 }
 0x2aa   : > { %v872_v21 = vpop.eup %871  ;;  %v627_v22 = vadd.f32 %v870_v14, %v615_v11 }
 0x2ab   : > { %v874_v23 = vpop.eup %873  ;;  %v626_v25 = vadd.f32 %v872_v21, %v614_v15 }
 0x2ac   : > { %v876_v26 = vpop.eup %875  ;;  %v553_v28 = vmul.f32 %v874_v23, %v851_v12  ;;  %v635_v30 = vmul.f32 %v771_v20, %v627_v22 }
 0x2ad   : > { %v552_v33 = vmul.f32 %v876_v26, %v850_v19  ;;  %v634_v34 = vmul.f32 %v771_v20, %v626_v25  ;;  %v878_v35 = vpop.eup %877 }
 0x2ae   : > { %v557_v36 = vadd.f32 %v553_v28, %v437_v59  ;;  %v639_v38 = vadd.f32 %v635_v30, %v603_v29  ;;  %v629_v41 = vadd.f32 %v878_v35, %v617_v31  ;;  %v604_v59 = vsub.f32 %v769_v16, %v1015_v0 }
 0x2af   : > { %v556_v39 = vadd.f32 %v552_v33, %v432_v63  ;;  %v638_v40 = vadd.f32 %v634_v34, %v602_v27  ;;  %v880_v42 = vpop.eup %879 }
 0x2b0   : > { %v773_v43 = vadd.f32 -1.0, %v639_v38  ;;  %v882_v44 = vpop.eup %881  ;;  %v555_v47 = vmul.f32 %v880_v42, %v856_v24  ;;  %v637_v52 = vmul.f32 %v771_v20, %v629_v41  ;;  %v766_v7 = vmul.f32 -1.442695, %v557_v36 }
 0x2b1   : > { %v772_v48 = vadd.f32 -1.0, %v638_v40  ;;  %v884_v45 = vpop.eup %883  ;;  %v554_v50 = vmul.f32 %v882_v44, %v855_v37  ;;  %v765_v6 = vmul.f32 -1.442695, %v556_v39 }
 0x2b2   : > { %v647_v51 = vmul.f32 0.5, %v773_v43  ;;  %v559_v53 = vadd.f32 %v555_v47, %v447_v9  ;;  %v628_v54 = vadd.f32 %v884_v45, %v616_v46  ;;  %v641_v58 = vadd.f32 %v637_v52, %v605_v49 }
 0x2b3   : > { %v558_v55 = vadd.f32 %v554_v50, %v442_v18  ;;  %v646_v57 = vmul.f32 0.5, %v772_v48  ;;  %885 = vpow2.f32 %v765_v6  ;;  %v561_v18 = vand.u32 127, %v560_v17 }
 0x2b4   : > { %v654_v56 = vsel %vm650_vm1, %v647_v51, 0.0  ;;  %v636_v60 = vmul.f32 %v771_v20, %v628_v54  ;;  %v775_v62 = vadd.f32 -1.0, %v641_v58  ;;  %v768_v0 = vmul.f32 -1.442695, %v559_v53 }
 0x2b5   : > { %655 = vadd.xlane.f32.xlu1 %v654_v56  ;;  %v651_v1 = vsel %vm650_vm1, %v646_v57, 0.0  ;;  %887 = vpow2.f32 %v766_v7  ;;  %v767_v8 = vmul.f32 -1.442695, %v558_v55  ;;  %vm562_vm2 = vcmp.lt.s32.totalorder %v561_v18, 2 }
 0x2b6   : > { %v640_v63 = vadd.f32 %v636_v60, %v604_v59  ;;  %v649_v2 = vmul.f32 0.5, %v775_v62  ;;  %889 = vpow2.f32 %v768_v0 }
 0x2b7   : > { %891 = vpow2.f32 %v767_v8 }
 0x2b8   : > { %v774_v61 = vadd.f32 -1.0, %v640_v63  ;;  %v660_v4 = vsel %vm650_vm1, %v649_v2, 0.0 }
 0x2b9   : > { %652 = vadd.xlane.f32.xlu1 %v651_v1 }
 0x2ba   : > { %v648_v3 = vmul.f32 0.5, %v774_v61 }
 0x2bc   : > { %v657_v5 = vsel %vm650_vm1, %v648_v3, 0.0 }
 0x2bd   : > { %661 = vadd.xlane.f32.xlu1 %v660_v4  ;;  %658 = vadd.xlane.f32.xlu0 %v657_v5  ;;  %v886_v9 = vpop.eup %885 }
 0x2be   : > { %v575_v11 = vadd.f32 1.0, %v886_v9 }
 0x2bf   : > { %v888_v10 = vpop.eup %887 }
 0x2c0   : > { %v890_v12 = vpop.eup %889  ;;  %v576_v13 = vadd.f32 1.0, %v888_v10  ;;  %893 = vrcp.f32 %v575_v11 }
 0x2c1   : > { %v892_v14 = vpop.eup %891  ;;  %v578_v15 = vadd.f32 1.0, %v890_v12 }
 0x2c2   : > { %895 = vrcp.f32 %v576_v13  ;;  %v577_v16 = vadd.f32 1.0, %v892_v14 }
 0x2c3   : > { %897 = vtanh.f32 %v556_v39 }
 0x2c4   : > { %899 = vtanh.f32 %v557_v36 }
 0x2c5   : > { %901 = vrcp.f32 %v578_v15 }
 0x2c6   : > { %903 = vrcp.f32 %v577_v16 }
 0x2c7   : > { %905 = vtanh.f32 %v559_v53 }
 0x2c8   : > { %907 = vtanh.f32 %v558_v55 }
 0x2ca   : > { %v894_v20 = vpop.eup %893 }
 0x2cc   : > { %v896_v21 = vpop.eup %895 }
 0x2cd   : > { %v898_v22 = vpop.eup %897 }
 0x2ce   : > { %v900_v23 = vpop.eup %899  ;;  %v591_v25 = vsel %vm562_vm2, %v894_v20, %v898_v22 }
 0x2cf   : > { %v902_v26 = vpop.eup %901  ;;  %v592_v27 = vsel %vm562_vm2, %v896_v21, %v900_v23 }
 0x2d0   : > { %v904_v29 = vpop.eup %903 }
 0x2d1   : > { %v906_v31 = vpop.eup %905 }
 0x2d2   : > { %v908_v32 = vpop.eup %907  ;;  %v594_v34 = vsel %vm562_vm2, %v902_v26, %v906_v31 }
 0x2d3   : > { %v593_v36 = vsel %vm562_vm2, %v904_v29, %v908_v32 }
 0x342   : > { %v656_v19 = vpop.xlane.xlu1 %655 }
 0x343   : > { %v664_v30 = vsel %vm650_vm1, %v592_v27, %v656_v19 }
 0x344   : > { %669 = vst.msk [vmem:[%s172_s28 + $0x8] sm:$0xff] %vm667_vm3, %v664_v30 }
 0x346   : > { %v653_v24 = vpop.xlane.xlu1 %652 }
 0x347   : > { %v663_v28 = vsel %vm650_vm1, %v591_v25, %v653_v24 }
 0x348   : > { %668 = vst.msk [vmem:[%s172_s28] sm:$0xff] %vm667_vm3, %v663_v28 }
 0x34a   : > { %v662_v33 = vpop.xlane.xlu1 %661  ;;  %v659_v35 = vpop.xlane.xlu0 %658 }
 0x34b   : > { %v666_v37 = vsel %vm650_vm1, %v594_v34, %v662_v33  ;;  %v665_v38 = vsel %vm650_vm1, %v593_v36, %v659_v35 }
 0x34c   : > { %670 = vst.msk [vmem:[%s172_s28 + $0x10] sm:$0xff] %vm667_vm3, %v665_v38  ;;  %671 = vst.msk [vmem:[%s172_s28 + $0x18] sm:$0xff] %vm667_vm3, %v666_v37 }
 0x34d PF: > { %s13_s12 = sadd.s32 1, %s915_s12  }
 0x34e   : > { %p10_p4 = scmp.ge.s32.totalorder %s13_s12, 4  }
 0x350   :  { %12 = sbr.rel (!%p10_p4) target bundleno = 1 (0x1), region = 62 }

</bundles_post_ra>
